<compile_context>
chip_gen: v7x
topology: tpu7x:2x2x1
jax: 0.10.0
libtpu: 0.0.40
codegen_flags: <defaults>
</compile_context>

<pallas_src>
import math

import jax
import jax.numpy as jnp
import numpy as np
from jax.experimental import pallas as pl
from jax.experimental.pallas import tpu as pltpu

_MIB = 1024 * 1024


def _masked_relu_kernel(x_ref, keep_ref, o_ref):
    # (tm, lc) * (1, lc): sublane broadcast of the precomputed keep-mask.
    # Multiply-by-mask (not select) mirrors torch's relu(x * mask) exactly.
    x = x_ref[...] * keep_ref[...]
    o_ref[...] = jnp.maximum(x, jnp.zeros_like(x))


def _relu_kernel(x_ref, o_ref):
    x = x_ref[...]
    o_ref[...] = jnp.maximum(x, jnp.zeros_like(x))


def _hw_params():
    """(vmem_capacity_bytes, tensorcore_count) with safe fallbacks."""
    vmem_cap = 128 * _MIB
    num_cores = 0
    try:
        info = pltpu.get_tpu_info()
        vmem_cap = int(getattr(info, "vmem_capacity_bytes", vmem_cap))
        for name in ("num_cores", "core_count", "tensorcore_count",
                     "num_tensorcores", "cores_per_chip"):
            val = getattr(info, name, None)
            if isinstance(val, int) and val > 0:
                num_cores = val
                break
    except Exception:
        pass
    if num_cores <= 0:
        # Heuristic: 64 MiB VMEM per core => v7x-class dual-TensorCore chip.
        num_cores = 2 if vmem_cap <= 64 * _MIB else 1
    return vmem_cap, num_cores


def _round_rows(tm, m, sub):
    """Clamp a row tile to <= m, keeping it sublane-aligned (or full-dim)."""
    if tm >= m:
        return m
    tm = max(sub, (tm // sub) * sub)
    return m if tm >= m else tm


def block_layer(x, size=1, *, target_block_bytes=None):
    """Pallas TPU implementation of Block_Layer(size).forward(x). x is NCHW."""
    n, c, h, w = x.shape
    s = int(size * h / 7)  # static; matches torch int(self.size * x.size(2) / 7)
    dtype = x.dtype
    itemsize = jnp.dtype(dtype).itemsize

    m = n * c
    l = h * w

    # ---- lane-dense flattening: pack whole planes per row ----------------
    reps = 128 // math.gcd(l, 128)      # planes per row so that L % 128 == 0
    if reps > 1 and m % reps != 0:
        reps = 1                        # fallback: plane-per-row (still correct)
    M = m // reps
    L = l * reps
    x2d = x.reshape(M, L)

    # ---- generation-aware budgets -----------------------------------------
    vmem_cap, num_cores = _hw_params()
    if vmem_cap <= 64 * _MIB:           # v7x-class (64 MiB VMEM per core)
        target_bytes, vmem_limit = 4 * _MIB, 32 * _MIB
    else:                               # v5e / v6e (128 MiB VMEM)
        target_bytes, vmem_limit = 6 * _MIB, 48 * _MIB
    if target_block_bytes is not None:
        target_bytes = int(target_block_bytes)

    sub = max(8, 32 // itemsize)        # sublane packing: f32->8, bf16->16, i8->32

    # ---- pick the (tm, lc) tile --------------------------------------------
    if L % 128 == 0 and sub * L * itemsize > target_bytes:
        # Very large spatial planes: tile the lane dimension too.
        lc = max(128, (target_bytes // (sub * itemsize)) // 128 * 128)
        lc = min(lc, L)
        tm = M if M < sub else sub
    else:
        lc = L
        tm = max(sub, (target_bytes // max(1, L * itemsize)) // sub * sub)
        tm = _round_rows(tm, M, sub)

    gm = pl.cdiv(M, tm)
    gl = pl.cdiv(L, lc)

    # ---- core-count-aware split (only pay for it on multi-TC chips) --------
    if num_cores > 1:
        min_blocks = 2 * num_cores      # >= 2 grid steps per TensorCore
        want_gm = pl.cdiv(min_blocks, gl)
        if gm * gl < min_blocks and M >= want_gm * sub:
            tm = _round_rows(pl.cdiv(M, want_gm), M, sub)
            gm = pl.cdiv(M, tm)

    # ---- specs / operands ----------------------------------------------------
    x_spec = pl.BlockSpec((tm, lc), lambda i, j: (i, j))
    out_spec = pl.BlockSpec((tm, lc), lambda i, j: (i, j))

    if s > 0:
        # Keep-mask depends only on lane position within a row (same for every
        # row of every block), so precompute it once as a (1, L) constant.
        plane = np.ones((h, w), dtype=np.float32)
        plane[:s, :s] = 0.0
        keep = jnp.asarray(np.tile(plane.reshape(-1), reps)[None, :], dtype=dtype)
        kernel = _masked_relu_kernel
        in_specs = [x_spec, pl.BlockSpec((1, lc), lambda i, j: (0, j))]
        operands = (x2d, keep)
    else:
        # s == 0 fast path: plain ReLU, no mask traffic or mask math at all.
        kernel = _relu_kernel
        in_specs = [x_spec]
        operands = (x2d,)

    out2d = pl.pallas_call(
        kernel,
        out_shape=jax.ShapeDtypeStruct((M, L), dtype),
        grid_spec=pltpu.PrefetchScalarGridSpec(
            num_scalar_prefetch=0,
            grid=(gm, gl),
            in_specs=in_specs,
            out_specs=out_spec,
        ),
        compiler_params=pltpu.CompilerParams(
            dimension_semantics=("parallel", "parallel"),
            vmem_limit_bytes=vmem_limit,
        ),
    )(*operands)

    return out2d.reshape(n, c, h, w)


def _reference(x, size=1):
    """Pure-JAX reference mirroring the PyTorch forward."""
    n, c, h, w = x.shape
    s = int(size * h / 7)
    mask = jnp.ones_like(x)
    mask = mask.at[:, :, :s, :s].set(0)
    return jnp.maximum(x * mask, jnp.zeros_like(x))


if __name__ == "__main__":
    key = jax.random.PRNGKey(0)
    k1, k2, k3, k4 = jax.random.split(key, 4)

    # Base case: NCHW with a 128-multiple plane (16x16 = 256 lanes).
    x = jax.random.normal(k1, (2, 4, 16, 16), dtype=jnp.float32)
    out = jax.block_until_ready(block_layer(x, size=1))
    ref = _reference(x, size=1)
    assert out.shape == ref.shape and out.dtype == ref.dtype
    assert jnp.array_equal(out, ref), "mismatch (size=1)"

    # Larger masked fraction.
    out3 = jax.block_until_ready(block_layer(x, size=3))
    assert jnp.array_equal(out3, _reference(x, size=3)), "mismatch (size=3)"

    # Multi-row-block path, plus a forced lane-tiled 2-D grid.
    x2 = jax.random.normal(k2, (2, 16, 32, 32), dtype=jnp.float32)
    out2 = jax.block_until_ready(block_layer(x2, size=2))
    assert jnp.array_equal(out2, _reference(x2, size=2)), "mismatch (multi-block)"
    out2b = jax.block_until_ready(
        block_layer(x2, size=2, target_block_bytes=16 * 1024))
    assert jnp.array_equal(out2b, _reference(x2, size=2)), "mismatch (lane-tiled)"

    # 7x7 planes (H*W = 49, not a multiple of 128): lane-dense plane grouping.
    x3 = jax.random.normal(k3, (2, 64, 7, 7), dtype=jnp.float32)
    out7 = jax.block_until_ready(block_layer(x3, size=1))
    assert jnp.array_equal(out7, _reference(x3, size=1)), "mismatch (7x7 grouped)"

    # 7x7 planes where grouping doesn't divide N*C: masked-store fallback path.
    x4 = jax.random.normal(k4, (2, 4, 7, 7), dtype=jnp.float32)
    out7b = jax.block_until_ready(block_layer(x4, size=1))
    assert jnp.array_equal(out7b, _reference(x4, size=1)), "mismatch (7x7 fallback)"

    print("KERNEL_OK")
</pallas_src>

<mosaic_0001>
module attributes {stable_mosaic.version = 11 : i64} {
  func.func @_masked_relu_kernel(%arg0: i32, %arg1: i32, %arg2: memref<8x256xf32, #tpu.memory_space<vmem>>, %arg3: memref<1x256xf32, #tpu.memory_space<vmem>>, %arg4: memref<8x256xf32, #tpu.memory_space<vmem>>) attributes {dimension_semantics = [#tpu.dimension_semantics<parallel>, #tpu.dimension_semantics<parallel>], iteration_bounds = array<i64: 1, 1>, scalar_prefetch = 0 : i64, scratch_operands = 0 : i64, tpu.core_type = #tpu.core_type<tc>, window_params = [{transform_indices = @transform_0, window_bounds = array<i64: 8, 256>}, {transform_indices = @transform_1, window_bounds = array<i64: 1, 256>}, {transform_indices = @transform_2, window_bounds = array<i64: 8, 256>}]} {
    %c0 = arith.constant 0 : index
    %c0_0 = arith.constant 0 : index
    %0 = vector.load %arg2[%c0, %c0_0] : memref<8x256xf32, #tpu.memory_space<vmem>>, vector<8x256xf32>
    %c0_1 = arith.constant 0 : index
    %c0_2 = arith.constant 0 : index
    %1 = vector.load %arg3[%c0_1, %c0_2] : memref<1x256xf32, #tpu.memory_space<vmem>>, vector<1x256xf32>
    %2 = vector.broadcast %1 : vector<1x256xf32> to vector<8x256xf32>
    %3 = arith.mulf %0, %2 : vector<8x256xf32>
    %cst = arith.constant 0.000000e+00 : f32
    %4 = vector.broadcast %cst : f32 to vector<8x256xf32>
    %5 = arith.maximumf %3, %4 : vector<8x256xf32>
    %c0_3 = arith.constant 0 : index
    %c0_4 = arith.constant 0 : index
    %6 = vector.load %arg4[%c0_3, %c0_4] : memref<8x256xf32, #tpu.memory_space<vmem>>, vector<8x256xf32>
    tpu.vector_store %arg4[%c0_3, %c0_4], %5 {strides = array<i32>} : memref<8x256xf32, #tpu.memory_space<vmem>>, vector<8x256xf32>,
    return
  }
  func.func @transform_0(%arg0: i32, %arg1: i32) -> (i32, i32) {
    %c0_i32 = arith.constant 0 : i32
    return %arg0, %arg1 : i32, i32
  }
  func.func @transform_1(%arg0: i32, %arg1: i32) -> (i32, i32) {
    %c0_i32 = arith.constant 0 : i32
    %c0_i32_0 = arith.constant 0 : i32
    return %c0_i32, %arg1 : i32, i32
  }
  func.func @transform_2(%arg0: i32, %arg1: i32) -> (i32, i32) {
    %c0_i32 = arith.constant 0 : i32
    return %arg0, %arg1 : i32, i32
  }
}

</mosaic_0001>

<bundles_post_ra>
// kernel: tpu_custom_call.1
= control target key start
LH: loop header
LB: loop body
LE: loop exit
PB: predicated region body
PF: predicated region fallthrough
CT: control target
= control target key end

     0   :  { %7 = vsyncpa [#allocation3], 0  ;;  %s153_s0 = inlined_call_operand.hbm [shape: f32[8,256], index: 0, kind: input, shape index: {}]   ;;  %s154_s1 = inlined_call_operand.vmem [shape: f32[1,256], index: 1, kind: input, shape index: {}]   ;;  %s155_s2 = inlined_call_operand.hbm [shape: f32[8,256], index: 2, kind: output, shape index: {}]  }
   0x1   :  { %8 = vsyncpa [#allocation4], 0  ;;  %s109_s9 = smov [#allocation2]   ;;  %s61_s13 = scalar_lea.hbm %s153_s0, 256 }
   0x2   :  { %s15_s10 = sshll.u32 %s109_s9, 4  ;;  %p62_p0 = scmp.ne.s32.totalorder %s153_s0, %s61_s13  ;;  %s16_s10 = int_to_ptr.vmem [resolvable:$true] %s15_s10 }
   0x3   :  { %p65_p1 = scmp.lt.u32.totalorder %s61_s13, %s153_s0 }
   0x5   :  { %p67_p2 = pnand %p65_p1, %p62_p0 }
   0x7   :  { %70 = shalt.err (!%p67_p2)
}
   0x8   :  { %s71_s18 = scalar_lea.vmem %s16_s10, 256  ;;  %p76_p4 = scmp.lt.s32.totalorder %s16_s10, %s16_s10 }
   0x9   :  { %p72_p3 = scmp.ne.s32.totalorder %s16_s10, %s71_s18  ;;  %p77_p5 = scmp.lt.s32.totalorder %s71_s18, %s71_s18 }
   0xb   :  { %p78_p6 = por %p77_p5, %p76_p4 }
   0xd   :  { %p79_p7 = pnand %p78_p6, %p72_p3 }
   0xf   :  { %82 = shalt.err (!%p79_p7)
}
  0x10   :  { %18 = dma.hbm_to_vmem [thread:$0]  %s153_s0, 256, %s16_s10, [#allocation3]  }
  0x11   :  { %105 = dma.done.wait [#allocation3], 256  }
  0x12   :  { %106 = vsyncadd [#allocation3], 4294967040  ;;  %v28_v0 = vlaneseq  ;;  %v24_v4 = vld [vmem:[#allocation2] sm:$0xff]  ;;  %v25_v6 = vld [vmem:[#allocation2 + $0x8] sm:$0xff]  ;;  %s110_s23 = smov [#allocation5]  }
  0x13   :  { %v26_v5 = vld [vmem:[%s154_s1] sm:$0x3]  ;;  %s50_s24 = sshll.u32 %s110_s23, 4  ;;  %s51_s24 = int_to_ptr.vmem [resolvable:$true] %s50_s24 }
  0x14   :  { %v29_v1 = vshrl.u32 %v28_v0, 7  ;;  %s83_s0 = scalar_lea.vmem %s51_s24, 256  ;;  %p88_p9 = scmp.lt.s32.totalorder %s51_s24, %s51_s24 }
  0x15   :  { %p84_p8 = scmp.ne.s32.totalorder %s51_s24, %s83_s0  ;;  %p89_p10 = scmp.lt.s32.totalorder %s83_s0, %s83_s0 }
  0x16   :  { %v30_v2 = vsub.s32 0, %v29_v1  ;;  %v34_v3 = vsub.s32 1, %v29_v1 }
  0x17   :  { %p90_p11 = por %p89_p10, %p88_p9 }
  0x18   :  { %v31_v7 = vrot.slane %v26_v5, %v30_v2  ;;  %v35_v8 = vrot.slane %v26_v5, %v34_v3 }
  0x19   :  { %p91_p12 = pnand %p90_p11, %p84_p8 }
  0x1a   :  { %v38_v9 = vmul.f32 %v31_v7, %v24_v4  ;;  %v39_v10 = vmul.f32 %v35_v8, %v25_v6 }
  0x1c   :  { %v40_v11 = vmax.f32 %v38_v9, 0.0  ;;  %v41_v12 = vmax.f32 %v39_v10, 0.0 }
  0x1e   :  { %42 = vst [vmem:[#allocation5] sm:$0xff] %v40_v11  ;;  %43 = vst [vmem:[#allocation5 + $0x8] sm:$0xff] %v41_v12 }
  0x1f   :  { %94 = shalt.err (!%p91_p12)
}
  0x20   :  { %s95_s26 = scalar_lea.hbm %s155_s2, 256 }
  0x21   :  { %p96_p13 = scmp.ne.s32.totalorder %s155_s2, %s95_s26  ;;  %p99_p0 = scmp.lt.u32.totalorder %s95_s26, %s155_s2 }
  0x23   :  { %p101_p1 = pnand %p99_p0, %p96_p13 }
  0x25   :  { %104 = shalt.err (!%p101_p1)
}
  0x26   :  { %53 = dma.vmem_to_hbm [thread:$0]  %s51_s24, 256, %s155_s2, [#allocation4]  }
  0x27   :  { %107 = dma.done.wait [#allocation4], 256  }
  0x28   :  { %108 = vsyncadd [#allocation4], 4294967040 }
  0x29   :  { %57 = vsyncpa [#allocation3], 1 }
  0x2a   :  { %58 = vsyncpa [#allocation4], 1 }

</bundles_post_ra>
